<compile_context>
chip_gen: v6e
topology: v6e:2x2x1
jax: 0.10.0
libtpu: 0.0.40
codegen_flags: <defaults>
</compile_context>

<pallas_src>
import jax
import jax.numpy as jnp
from jax.experimental import pallas as pl
from jax.experimental.pallas import tpu as pltpu


SOFTPLUS_THRESHOLD = 5.0          # nn.Softplus(threshold=5), beta = 1 (module default)
VMEM_BUDGET_BYTES = 48 << 20      # conservative per-TC budget (v7x has 64 MiB per TensorCore)


def linreg_softplus_kernel(x_ref, w_ref, b_ref, o_ref):
    # h = x @ W, with W already laid out as (p, m_pad): plain (K, N) contraction on the MXU.
    h = jnp.dot(x_ref[...], w_ref[...], preferred_element_type=jnp.float32)
    h = h + b_ref[...]                      # (1, m_pad) broadcasts over the batch tile

    # Softplus(beta=1, threshold=5): log1p(exp(h)) if h <= 5 else h.
    # Clamp the exp argument so the untaken where() branch can't overflow; this also keeps
    # garbage rows of a ragged final batch tile finite (their stores are dropped by Pallas).
    sp = jnp.log1p(jnp.exp(jnp.minimum(h, SOFTPLUS_THRESHOLD)))
    o_ref[...] = jnp.where(h > SOFTPLUS_THRESHOLD, h, sp).astype(o_ref.dtype)


def prepare_linear_params(weight, bias):
    """One-time parameter prep (hoisted out of the forward call).

    weight: (m, p) PyTorch nn.Linear layout; bias: (m,).
    Returns (w_t, b2d, m) with w_t: (p, m_pad) and b2d: (1, m_pad), m_pad lane-dense.
    """
    m, p = weight.shape
    lane = 256 if m >= 128 else 128          # v6e/v7x MXU is 2x256^2; 128 suffices below that
    m_pad = ((m + lane - 1) // lane) * lane
    if m_pad != m:
        weight = jnp.pad(weight, ((0, m_pad - m), (0, 0)))
        bias = jnp.pad(bias, ((0, m_pad - m),))
    w_t = jnp.asarray(weight, jnp.float32).T             # (p, m_pad) — one-time transpose
    b2d = jnp.asarray(bias, jnp.float32).reshape(1, m_pad)
    return w_t, b2d, m


def _build_call(B, p, m_pad, tb, resident_pipeline_mode):
    grid = (pl.cdiv(B, tb),)
    if resident_pipeline_mode is None:
        w_spec = pl.BlockSpec((p, m_pad), lambda i: (0, 0))
        b_spec = pl.BlockSpec((1, m_pad), lambda i: (0, 0))
    else:
        w_spec = pl.BlockSpec((p, m_pad), lambda i: (0, 0),
                              pipeline_mode=resident_pipeline_mode)
        b_spec = pl.BlockSpec((1, m_pad), lambda i: (0, 0),
                              pipeline_mode=resident_pipeline_mode)

    cost = pl.CostEstimate(
        flops=2 * B * p * m_pad,
        transcendentals=2 * B * m_pad,                      # exp + log1p per output element
        bytes_accessed=4 * (B * p + p * m_pad + m_pad + B * m_pad),
    )

    return pl.pallas_call(
        linreg_softplus_kernel,
        out_shape=jax.ShapeDtypeStruct((B, m_pad), jnp.float32),
        grid=grid,
        in_specs=[
            pl.BlockSpec((tb, p), lambda i: (i, 0)),        # x: batch-tiled, double-buffered
            w_spec,                                         # W: resident across all tiles
            b_spec,                                         # bias: resident
        ],
        out_specs=pl.BlockSpec((tb, m_pad), lambda i: (i, 0)),  # lane-dense output tile
        compiler_params=pltpu.CompilerParams(
            dimension_semantics=("parallel",),              # megacore-shard the batch axis
            vmem_limit_bytes=VMEM_BUDGET_BYTES,
        ),
        cost_estimate=cost,
    )


def linear_regression_forward(x, w_t, b2d, m, *, max_block_b=2048):
    """x: (B, p) f32; w_t: (p, m_pad) f32; b2d: (1, m_pad) f32; m: true output width."""
    B, p = x.shape
    m_pad = w_t.shape[1]

    # Batch tile: multiple of 8, sized so double-buffered x/out tiles plus the resident
    # weight/bias fit the per-TC VMEM budget (dominant constraint on v7x's 64 MiB/TC).
    bytes_per_row = 2 * (p + m_pad) * 4                     # double-buffered x + out rows
    resident_bytes = 2 * (p * m_pad + m_pad) * 4            # worst case: W/bias double-buffered
    tb_cap = max(8, ((VMEM_BUDGET_BYTES - resident_bytes) // max(bytes_per_row, 1)) // 8 * 8)
    tb = min(max_block_b, ((B + 7) // 8) * 8, tb_cap)

    try:
        # Resident W/bias single-buffered (constant index_map -> double buffers are dead VMEM).
        out = _build_call(B, p, m_pad, tb, pl.Buffered(1))(x, w_t, b2d)
    except Exception:
        # Fallback: default (double) buffering if this JAX rejects buffer_count=1.
        out = _build_call(B, p, m_pad, tb, None)(x, w_t, b2d)

    return out if m == m_pad else out[:, :m]


if __name__ == "__main__":
    # Small shapes consistent with the module: batch=8, p=32 features, m=16 outputs.
    B, p, m = 8, 32, 16
    key = jax.random.PRNGKey(0)
    kx, kw, kb = jax.random.split(key, 3)

    x = jax.random.normal(kx, (B, p), dtype=jnp.float32)
    # Deterministic init mimicking nn.Linear's uniform(-1/sqrt(p), 1/sqrt(p))
    bound = 1.0 / jnp.sqrt(jnp.float32(p))
    weight = jax.random.uniform(kw, (m, p), minval=-bound, maxval=bound, dtype=jnp.float32)
    bias = jax.random.uniform(kb, (m,), minval=-bound, maxval=bound, dtype=jnp.float32)

    # One-time parameter prep (hoisted out of the forward, per perf review).
    w_t, b2d, m_out = prepare_linear_params(weight, bias)

    def softplus_ref(h):
        return jnp.where(h > 5.0, h, jnp.log1p(jnp.exp(jnp.minimum(h, 5.0))))

    out = jax.block_until_ready(linear_regression_forward(x, w_t, b2d, m_out))
    ref = softplus_ref(x @ weight.T + bias)
    assert out.shape == (B, m)
    assert jnp.allclose(out, ref, atol=1e-5, rtol=1e-5)

    # Ragged-batch check (B not a multiple of the tile): garbage rows in the final tile are
    # clamped in-kernel and their stores dropped by Pallas, so results must still match.
    B2 = 13
    x2 = jax.random.normal(jax.random.PRNGKey(1), (B2, p), dtype=jnp.float32)
    out2 = jax.block_until_ready(linear_regression_forward(x2, w_t, b2d, m_out))
    ref2 = softplus_ref(x2 @ weight.T + bias)
    assert out2.shape == (B2, m)
    assert jnp.allclose(out2, ref2, atol=1e-5, rtol=1e-5)

    print("KERNEL_OK")
</pallas_src>

<mosaic_0001>
module attributes {stable_mosaic.version = 11 : i64} {
  func.func @linreg_softplus_kernel(%arg0: i32, %arg1: memref<8x32xf32, #tpu.memory_space<vmem>>, %arg2: memref<32x128xf32, #tpu.memory_space<vmem>>, %arg3: memref<1x128xf32, #tpu.memory_space<vmem>>, %arg4: memref<8x128xf32, #tpu.memory_space<vmem>>) attributes {dimension_semantics = [#tpu.dimension_semantics<parallel>], iteration_bounds = array<i64: 1>, scalar_prefetch = 0 : i64, scratch_operands = 0 : i64, tpu.core_type = #tpu.core_type<tc>, window_params = [{transform_indices = @transform_0, window_bounds = array<i64: 8, 32>}, {pipeline_mode = #tpu.pipeline_mode<synchronous>, transform_indices = @transform_1, window_bounds = array<i64: 32, 128>}, {pipeline_mode = #tpu.pipeline_mode<synchronous>, transform_indices = @transform_2, window_bounds = array<i64: 1, 128>}, {transform_indices = @transform_3, window_bounds = array<i64: 8, 128>}]} {
    %c0 = arith.constant 0 : index
    %c0_0 = arith.constant 0 : index
    %0 = vector.load %arg1[%c0, %c0_0] : memref<8x32xf32, #tpu.memory_space<vmem>>, vector<8x32xf32>
    %c0_1 = arith.constant 0 : index
    %c0_2 = arith.constant 0 : index
    %1 = vector.load %arg2[%c0_1, %c0_2] : memref<32x128xf32, #tpu.memory_space<vmem>>, vector<32x128xf32>
    %cst = arith.constant dense<0.000000e+00> : vector<8x128xf32>
    %2 = tpu.matmul %0, %1, %cst {dimension_numbers = #tpu.dot_dimension_numbers<[1], [0], [0], [1], [0, 0, 1, 1], [], []>} : vector<8x32xf32>, vector<32x128xf32>, vector<8x128xf32> -> vector<8x128xf32>
    %c0_3 = arith.constant 0 : index
    %c0_4 = arith.constant 0 : index
    %3 = vector.load %arg3[%c0_3, %c0_4] : memref<1x128xf32, #tpu.memory_space<vmem>>, vector<1x128xf32>
    %4 = vector.broadcast %3 : vector<1x128xf32> to vector<8x128xf32>
    %5 = arith.addf %2, %4 : vector<8x128xf32>
    %cst_5 = arith.constant 5.000000e+00 : f32
    %6 = vector.broadcast %cst_5 : f32 to vector<8x128xf32>
    %7 = arith.minimumf %5, %6 : vector<8x128xf32>
    %8 = math.exp %7 : vector<8x128xf32>
    %9 = math.log1p %8 : vector<8x128xf32>
    %cst_6 = arith.constant 5.000000e+00 : f32
    %10 = vector.broadcast %cst_6 : f32 to vector<8x128xf32>
    %11 = arith.cmpf ogt, %5, %10 : vector<8x128xf32>
    %12 = arith.select %11, %5, %9 : vector<8x128xi1>, vector<8x128xf32>
    %c0_7 = arith.constant 0 : index
    %c0_8 = arith.constant 0 : index
    %13 = vector.load %arg4[%c0_7, %c0_8] : memref<8x128xf32, #tpu.memory_space<vmem>>, vector<8x128xf32>
    tpu.vector_store %arg4[%c0_7, %c0_8], %12 {strides = array<i32>} : memref<8x128xf32, #tpu.memory_space<vmem>>, vector<8x128xf32>,
    return
  }
  func.func @transform_0(%arg0: i32) -> (i32, i32) {
    %c0_i32 = arith.constant 0 : i32
    %c0_i32_0 = arith.constant 0 : i32
    return %arg0, %c0_i32 : i32, i32
  }
  func.func @transform_1(%arg0: i32) -> (i32, i32) {
    %c0_i32 = arith.constant 0 : i32
    %c0_i32_0 = arith.constant 0 : i32
    %c0_i32_1 = arith.constant 0 : i32
    return %c0_i32, %c0_i32_0 : i32, i32
  }
  func.func @transform_2(%arg0: i32) -> (i32, i32) {
    %c0_i32 = arith.constant 0 : i32
    %c0_i32_0 = arith.constant 0 : i32
    %c0_i32_1 = arith.constant 0 : i32
    return %c0_i32, %c0_i32_0 : i32, i32
  }
  func.func @transform_3(%arg0: i32) -> (i32, i32) {
    %c0_i32 = arith.constant 0 : i32
    %c0_i32_0 = arith.constant 0 : i32
    return %arg0, %c0_i32 : i32, i32
  }
}

module attributes {stable_mosaic.version = 11 : i64} {
  func.func @linreg_softplus_kernel(%arg0: i32, %arg1: memref<8x32xf32, #tpu.memory_space<vmem>>, %arg2: memref<32x128xf32, #tpu.memory_space<vmem>>, %arg3: memref<1x128xf32, #tpu.memory_space<vmem>>, %arg4: memref<8x128xf32, #tpu.memory_space<vmem>>) attributes {dimension_semantics = [#tpu.dimension_semantics<parallel>], iteration_bounds = array<i64: 1>, scalar_prefetch = 0 : i64, scratch_operands = 0 : i64, tpu.core_type = #tpu.core_type<tc>, window_params = [{transform_indices = @transform_0, window_bounds = array<i64: 8, 32>}, {pipeline_mode = #tpu.pipeline_mode<synchronous>, transform_indices = @transform_1, window_bounds = array<i64: 32, 128>}, {pipeline_mode = #tpu.pipeline_mode<synchronous>, transform_indices = @transform_2, window_bounds = array<i64: 1, 128>}, {transform_indices = @transform_3, window_bounds = array<i64: 8, 128>}]} {
    %c0 = arith.constant 0 : index
    %c0_0 = arith.constant 0 : index
    %0 = vector.load %arg1[%c0, %c0_0] : memref<8x32xf32, #tpu.memory_space<vmem>>, vector<8x32xf32>
    %c0_1 = arith.constant 0 : index
    %c0_2 = arith.constant 0 : index
    %1 = vector.load %arg2[%c0_1, %c0_2] : memref<32x128xf32, #tpu.memory_space<vmem>>, vector<32x128xf32>
    %cst = arith.constant dense<0.000000e+00> : vector<8x128xf32>
    %2 = tpu.matmul %0, %1, %cst {dimension_numbers = #tpu.dot_dimension_numbers<[1], [0], [0], [1], [0, 0, 1, 1], [], []>} : vector<8x32xf32>, vector<32x128xf32>, vector<8x128xf32> -> vector<8x128xf32>
    %c0_3 = arith.constant 0 : index
    %c0_4 = arith.constant 0 : index
    %3 = vector.load %arg3[%c0_3, %c0_4] : memref<1x128xf32, #tpu.memory_space<vmem>>, vector<1x128xf32>
    %4 = vector.broadcast %3 : vector<1x128xf32> to vector<8x128xf32>
    %5 = arith.addf %2, %4 : vector<8x128xf32>
    %cst_5 = arith.constant 5.000000e+00 : f32
    %6 = vector.broadcast %cst_5 : f32 to vector<8x128xf32>
    %7 = arith.minimumf %5, %6 : vector<8x128xf32>
    %8 = math.exp %7 : vector<8x128xf32>
    %9 = math.log1p %8 : vector<8x128xf32>
    %cst_6 = arith.constant 5.000000e+00 : f32
    %10 = vector.broadcast %cst_6 : f32 to vector<8x128xf32>
    %11 = arith.cmpf ogt, %5, %10 : vector<8x128xf32>
    %12 = arith.select %11, %5, %9 : vector<8x128xi1>, vector<8x128xf32>
    %c0_7 = arith.constant 0 : index
    %c0_8 = arith.constant 0 : index
    %13 = vector.load %arg4[%c0_7, %c0_8] : memref<8x128xf32, #tpu.memory_space<vmem>>, vector<8x128xf32>
    tpu.vector_store %arg4[%c0_7, %c0_8], %12 {strides = array<i32>} : memref<8x128xf32, #tpu.memory_space<vmem>>, vector<8x128xf32>,
    return
  }
  func.func @transform_0(%arg0: i32) -> (i32, i32) {
    %c0_i32 = arith.constant 0 : i32
    %c0_i32_0 = arith.constant 0 : i32
    return %arg0, %c0_i32 : i32, i32
  }
  func.func @transform_1(%arg0: i32) -> (i32, i32) {
    %c0_i32 = arith.constant 0 : i32
    %c0_i32_0 = arith.constant 0 : i32
    %c0_i32_1 = arith.constant 0 : i32
    return %c0_i32, %c0_i32_0 : i32, i32
  }
  func.func @transform_2(%arg0: i32) -> (i32, i32) {
    %c0_i32 = arith.constant 0 : i32
    %c0_i32_0 = arith.constant 0 : i32
    %c0_i32_1 = arith.constant 0 : i32
    return %c0_i32, %c0_i32_0 : i32, i32
  }
  func.func @transform_3(%arg0: i32) -> (i32, i32) {
    %c0_i32 = arith.constant 0 : i32
    %c0_i32_0 = arith.constant 0 : i32
    return %arg0, %c0_i32 : i32, i32
  }
}

</mosaic_0001>

<bundles_post_ra>
// kernel: tpu_custom_call.1
= control target key start
LH: loop header
LB: loop body
LE: loop exit
PB: predicated region body
PF: predicated region fallthrough
CT: control target
= control target key end

     0   :  { %8 = vsyncpa [#allocation3], 0  ;;  %s292_s0 = inlined_call_operand.hbm [shape: f32[8,32], index: 0, kind: input, shape index: {}]   ;;  %s293_s1 = inlined_call_operand.hbm [shape: f32[32,128], index: 1, kind: input, shape index: {}]   ;;  %s294_s2 = inlined_call_operand.vmem [shape: f32[1,128], index: 2, kind: input, shape index: {}]   ;;  %s295_s3 = inlined_call_operand.hbm [shape: f32[8,128], index: 3, kind: output, shape index: {}]  }
   0x1   :  { %9 = vsyncpa [#allocation6], 0 }
   0x2   :  { %10 = vsyncpa [#allocation4], 0  ;;  %s253_s12 = smov [#allocation2]   ;;  %s254_s14 = smov [#allocation5]  }
   0x3   :  { %s17_s13 = sshll.u32 %s253_s12, 4  ;;  %s26_s15 = sshll.u32 %s254_s14, 4  ;;  %s18_s13 = int_to_ptr.vmem [resolvable:$true] %s17_s13  ;;  %s27_s15 = int_to_ptr.vmem [resolvable:$true] %s26_s15 }
   0x4   :  { %s195_s16 = scalar_lea.vmem %s18_s13, 128  ;;  %p200_p1 = scmp.lt.s32.totalorder %s18_s13, %s18_s13 }
   0x5   :  { %p196_p0 = scmp.ne.s32.totalorder %s18_s13, %s195_s16  ;;  %p201_p2 = scmp.lt.s32.totalorder %s195_s16, %s195_s16 }
   0x7   :  { %p202_p3 = por %p201_p2, %p200_p1 }
   0x9   :  { %p203_p4 = pnand %p202_p3, %p196_p0 }
   0xb   :  { %206 = shalt.err (!%p203_p4)
}
   0xc   :  { %20 = dma.hbm_to_vmem [thread:$0]  %s292_s0, 128, %s18_s13, [#allocation3]  }
   0xd   :  { %s215_s19 = scalar_lea.vmem %s27_s15, 512  ;;  %p220_p6 = scmp.lt.s32.totalorder %s27_s15, %s27_s15 }
   0xe   :  { %p216_p5 = scmp.ne.s32.totalorder %s27_s15, %s215_s19  ;;  %p221_p7 = scmp.lt.s32.totalorder %s215_s19, %s215_s19 }
  0x10   :  { %p222_p8 = por %p221_p7, %p220_p6 }
  0x12   :  { %p223_p9 = pnand %p222_p8, %p216_p5 }
  0x14   :  { %226 = shalt.err (!%p223_p9)
}
  0x15   :  { %s255_s20 = smov 128   ;;  %s256_s21 = smov 8  }
  0x16   :  { %32 = dma.hbm_to_vmem [thread:$0]  %s293_s1, 512, %s27_s15, [#allocation6], %s255_s20, %s255_s20, %s256_s21  }
  0x17   :  { %247 = dma.done.wait [#allocation3], 128  }
  0x18   :  { %248 = vsyncadd [#allocation3], 4294967168 }
  0x19   :  { %249 = dma.done.wait [#allocation6], 512  }
  0x1a   :  { %250 = vsyncadd [#allocation6], 4294966784  ;;  %v257_v0 = vmov 0.0   ;;  %vm258_vm0 = vmmov 0   ;;  %v45_v1 = vld [vmem:[#allocation5 + $0x18] sm:$0xff]  ;;  %v44_v2 = vld [vmem:[#allocation5 + $0x10] sm:$0xff] }
  0x1b   :  { %165 = vmatprep.subr.mxu0 %v257_v0  ;;  %173 = vmatprep.mubr.msk.f32.mxu0 %vm258_vm0, %v257_v0  ;;  %v43_v3 = vld [vmem:[#allocation5 + $0x8] sm:$0xff]  ;;  %v42_v4 = vld [vmem:[#allocation5] sm:$0xff]  ;;  %v41_v5 = vld [vmem:[#allocation2] sm:$0xff]  ;;  %vm53_vm1 = vcmask 261120   ;;  %s259_s24 = smov [#allocation7]  }
  0x1c   :  { %166 = vmatpush3.msra.mxu0 %v45_v1  ;;  %v158_v6 = vld [vmem:[%s294_s2] ss:$0 sm:$0xff]  ;;  %s148_s25 = sshll.u32 %s259_s24, 4  ;;  %s149_s25 = int_to_ptr.vmem [resolvable:$true] %s148_s25 }
  0x1d   :  { %167 = vmatprep.subr.mxu0 %v257_v0  ;;  %s227_s2 = scalar_lea.vmem %s149_s25, 128  ;;  %p232_p11 = scmp.lt.s32.totalorder %s149_s25, %s149_s25 }
  0x1e   :  { %168 = vmatpush3.msra.mxu0 %v44_v2  ;;  %p228_p10 = scmp.ne.s32.totalorder %s149_s25, %s227_s2  ;;  %p233_p12 = scmp.lt.s32.totalorder %s227_s2, %s227_s2 }
  0x1f   :  { %169 = vmatprep.subr.mxu0 %v257_v0 }
  0x20   :  { %170 = vmatpush3.msra.mxu0 %v43_v3  ;;  %p234_p13 = por %p233_p12, %p232_p11 }
  0x21   :  { %171 = vmatprep.subr.mxu0 %v257_v0 }
  0x22   :  { %172 = vmatpush3.msra.mxu0 %v42_v4  ;;  %p235_p0 = pnand %p234_p13, %p228_p10 }
  0x23   :  { %174 = vmatmul.mubr.msk.f32.vlgmr.msra.gmra.mxu0 %vm53_vm1, %v41_v5 }
  0xe3   :  { %v123_v7 = vpop.f32.mrf.mxu0 }
  0xe4   :  { %v124_v8 = vadd.f32 %v158_v6, %v123_v7 }
  0xe5   :  { %v175_v9 = vpop.f32.mrf.mxu0 }
  0xe6   :  { %v127_v10 = vmin.f32 %v124_v8, 5.0  ;;  %vm139_vm3 = vcmp.gt.f32.partialorder %v124_v8, 5.0 }
  0xe8   :  { %v128_v11 = vmul.f32 1.442695, %v127_v10 }
  0xea   :  { %183 = vpow2.f32 %v128_v11 }
  0xf7   :  { %v184_v12 = vpop.eup %183 }
  0xf8   :  { %v130_v13 = vadd.f32 1.0, %v184_v12  ;;  %v133_v14 = vmul.f32 -0.5, %v184_v12  ;;  %v136_v16 = vand.u32 2147483647, %v184_v12 }
  0xfa   :  { %185 = vlog2.f32 %v130_v13  ;;  %v134_v15 = vadd.f32 1.0, %v133_v14  ;;  %vm137_vm2 = vcmp.lt.f32.partialorder %v136_v16, 0.0004427343 }
  0xfc   :  { %v135_v19 = vmul.f32 %v184_v12, %v134_v15 }
 0x107   :  { %v186_v17 = vpop.eup %185 }
 0x108   :  { %v132_v18 = vmul.f32 0.6931472, %v186_v17 }
 0x10a   :  { %v138_v20 = vsel %vm137_vm2, %v135_v19, %v132_v18 }
 0x10b   :  { %v140_v21 = vsel %vm139_vm3, %v124_v8, %v138_v20 }
 0x10c   :  { %141 = vst [vmem:[#allocation7] sm:$0xff] %v140_v21 }
 0x10d   :  { %238 = shalt.err (!%p235_p0)
}
 0x10e   :  { %151 = dma.vmem_to_hbm [thread:$0]  %s149_s25, 128, %s295_s3, [#allocation4]  }
 0x10f   :  { %251 = dma.done.wait [#allocation4], 128  }
 0x110   :  { %252 = vsyncadd [#allocation4], 4294967168 }
 0x111   :  { %155 = vsyncpa [#allocation3], 1 }
 0x112   :  { %156 = vsyncpa [#allocation6], 1 }
 0x113   :  { %157 = vsyncpa [#allocation4], 1 }

// kernel: tpu_custom_call.1
= control target key start
LH: loop header
LB: loop body
LE: loop exit
PB: predicated region body
PF: predicated region fallthrough
CT: control target
= control target key end

     0   :  { %8 = vsyncpa [#allocation3], 0  ;;  %s292_s0 = inlined_call_operand.hbm [shape: f32[8,32], index: 0, kind: input, shape index: {}]   ;;  %s293_s1 = inlined_call_operand.hbm [shape: f32[32,128], index: 1, kind: input, shape index: {}]   ;;  %s294_s2 = inlined_call_operand.vmem [shape: f32[1,128], index: 2, kind: input, shape index: {}]   ;;  %s295_s3 = inlined_call_operand.hbm [shape: f32[8,128], index: 3, kind: output, shape index: {}]  }
   0x1   :  { %9 = vsyncpa [#allocation6], 0 }
   0x2   :  { %10 = vsyncpa [#allocation4], 0  ;;  %s253_s12 = smov [#allocation2]   ;;  %s254_s14 = smov [#allocation5]  }
   0x3   :  { %s17_s13 = sshll.u32 %s253_s12, 4  ;;  %s26_s15 = sshll.u32 %s254_s14, 4  ;;  %s18_s13 = int_to_ptr.vmem [resolvable:$true] %s17_s13  ;;  %s27_s15 = int_to_ptr.vmem [resolvable:$true] %s26_s15 }
   0x4   :  { %s195_s16 = scalar_lea.vmem %s18_s13, 128  ;;  %p200_p1 = scmp.lt.s32.totalorder %s18_s13, %s18_s13 }
   0x5   :  { %p196_p0 = scmp.ne.s32.totalorder %s18_s13, %s195_s16  ;;  %p201_p2 = scmp.lt.s32.totalorder %s195_s16, %s195_s16 }
   0x7   :  { %p202_p3 = por %p201_p2, %p200_p1 }
   0x9   :  { %p203_p4 = pnand %p202_p3, %p196_p0 }
   0xb   :  { %206 = shalt.err (!%p203_p4)
}
   0xc   :  { %20 = dma.hbm_to_vmem [thread:$0]  %s292_s0, 128, %s18_s13, [#allocation3]  }
   0xd   :  { %s215_s19 = scalar_lea.vmem %s27_s15, 512  ;;  %p220_p6 = scmp.lt.s32.totalorder %s27_s15, %s27_s15 }
   0xe   :  { %p216_p5 = scmp.ne.s32.totalorder %s27_s15, %s215_s19  ;;  %p221_p7 = scmp.lt.s32.totalorder %s215_s19, %s215_s19 }
  0x10   :  { %p222_p8 = por %p221_p7, %p220_p6 }
  0x12   :  { %p223_p9 = pnand %p222_p8, %p216_p5 }
  0x14   :  { %226 = shalt.err (!%p223_p9)
}
  0x15   :  { %s255_s20 = smov 128   ;;  %s256_s21 = smov 8  }
  0x16   :  { %32 = dma.hbm_to_vmem [thread:$0]  %s293_s1, 512, %s27_s15, [#allocation6], %s255_s20, %s255_s20, %s256_s21  }
  0x17   :  { %247 = dma.done.wait [#allocation3], 128  }
  0x18   :  { %248 = vsyncadd [#allocation3], 4294967168 }
  0x19   :  { %249 = dma.done.wait [#allocation6], 512  }
  0x1a   :  { %250 = vsyncadd [#allocation6], 4294966784  ;;  %v257_v0 = vmov 0.0   ;;  %vm258_vm0 = vmmov 0   ;;  %v45_v1 = vld [vmem:[#allocation5 + $0x18] sm:$0xff]  ;;  %v44_v2 = vld [vmem:[#allocation5 + $0x10] sm:$0xff] }
  0x1b   :  { %165 = vmatprep.subr.mxu0 %v257_v0  ;;  %173 = vmatprep.mubr.msk.f32.mxu0 %vm258_vm0, %v257_v0  ;;  %v43_v3 = vld [vmem:[#allocation5 + $0x8] sm:$0xff]  ;;  %v42_v4 = vld [vmem:[#allocation5] sm:$0xff]  ;;  %v41_v5 = vld [vmem:[#allocation2] sm:$0xff]  ;;  %vm53_vm1 = vcmask 261120   ;;  %s259_s24 = smov [#allocation7]  }
  0x1c   :  { %166 = vmatpush3.msra.mxu0 %v45_v1  ;;  %v158_v6 = vld [vmem:[%s294_s2] ss:$0 sm:$0xff]  ;;  %s148_s25 = sshll.u32 %s259_s24, 4  ;;  %s149_s25 = int_to_ptr.vmem [resolvable:$true] %s148_s25 }
  0x1d   :  { %167 = vmatprep.subr.mxu0 %v257_v0  ;;  %s227_s2 = scalar_lea.vmem %s149_s25, 128  ;;  %p232_p11 = scmp.lt.s32.totalorder %s149_s25, %s149_s25 }
  0x1e   :  { %168 = vmatpush3.msra.mxu0 %v44_v2  ;;  %p228_p10 = scmp.ne.s32.totalorder %s149_s25, %s227_s2  ;;  %p233_p12 = scmp.lt.s32.totalorder %s227_s2, %s227_s2 }
  0x1f   :  { %169 = vmatprep.subr.mxu0 %v257_v0 }
  0x20   :  { %170 = vmatpush3.msra.mxu0 %v43_v3  ;;  %p234_p13 = por %p233_p12, %p232_p11 }
  0x21   :  { %171 = vmatprep.subr.mxu0 %v257_v0 }
  0x22   :  { %172 = vmatpush3.msra.mxu0 %v42_v4  ;;  %p235_p0 = pnand %p234_p13, %p228_p10 }
  0x23   :  { %174 = vmatmul.mubr.msk.f32.vlgmr.msra.gmra.mxu0 %vm53_vm1, %v41_v5 }
  0xe3   :  { %v123_v7 = vpop.f32.mrf.mxu0 }
  0xe4   :  { %v124_v8 = vadd.f32 %v158_v6, %v123_v7 }
  0xe5   :  { %v175_v9 = vpop.f32.mrf.mxu0 }
  0xe6   :  { %v127_v10 = vmin.f32 %v124_v8, 5.0  ;;  %vm139_vm3 = vcmp.gt.f32.partialorder %v124_v8, 5.0 }
  0xe8   :  { %v128_v11 = vmul.f32 1.442695, %v127_v10 }
  0xea   :  { %183 = vpow2.f32 %v128_v11 }
  0xf7   :  { %v184_v12 = vpop.eup %183 }
  0xf8   :  { %v130_v13 = vadd.f32 1.0, %v184_v12  ;;  %v133_v14 = vmul.f32 -0.5, %v184_v12  ;;  %v136_v16 = vand.u32 2147483647, %v184_v12 }
  0xfa   :  { %185 = vlog2.f32 %v130_v13  ;;  %v134_v15 = vadd.f32 1.0, %v133_v14  ;;  %vm137_vm2 = vcmp.lt.f32.partialorder %v136_v16, 0.0004427343 }
  0xfc   :  { %v135_v19 = vmul.f32 %v184_v12, %v134_v15 }
 0x107   :  { %v186_v17 = vpop.eup %185 }
 0x108   :  { %v132_v18 = vmul.f32 0.6931472, %v186_v17 }
 0x10a   :  { %v138_v20 = vsel %vm137_vm2, %v135_v19, %v132_v18 }
 0x10b   :  { %v140_v21 = vsel %vm139_vm3, %v124_v8, %v138_v20 }
 0x10c   :  { %141 = vst [vmem:[#allocation7] sm:$0xff] %v140_v21 }
 0x10d   :  { %238 = shalt.err (!%p235_p0)
}
 0x10e   :  { %151 = dma.vmem_to_hbm [thread:$0]  %s149_s25, 128, %s295_s3, [#allocation4]  }
 0x10f   :  { %251 = dma.done.wait [#allocation4], 128  }
 0x110   :  { %252 = vsyncadd [#allocation4], 4294967168 }
 0x111   :  { %155 = vsyncpa [#allocation3], 1 }
 0x112   :  { %156 = vsyncpa [#allocation6], 1 }
 0x113   :  { %157 = vsyncpa [#allocation4], 1 }

</bundles_post_ra>
